<compile_context>
chip_gen: v7x
topology: tpu7x:2x2x1
jax: 0.10.0
libtpu: 0.0.40
codegen_flags: <defaults>
</compile_context>

<pallas_src>
import functools

import jax
import jax.numpy as jnp
from jax import lax
from jax.experimental import pallas as pl
from jax.experimental.pallas import tpu as pltpu


def _round_up(v, m):
    return ((v + m - 1) // m) * m


def _cdiv(a, b):
    return -(-a // b)


def _vmem_limit_bytes():
    # ~100 MiB is fine on v5e/v6e (128 MiB physical); v7x has 64 MiB per TC,
    # so cap at 75% of whatever the chip reports, falling back to a value that
    # is safe on every generation while still above the 16/32 MiB defaults.
    try:
        cap = pltpu.get_tpu_info().vmem_capacity_bytes
        return int(min(100 * 1024 * 1024, (int(cap) * 3) // 4))
    except Exception:
        return 48 * 1024 * 1024


def _onehot_kernel(idx_ref, ea_ref, xw_ref, we_ref, out_ref, *, n_nodes):
    """One edge tile: on-chip gather via a single bf16 one-hot MXU matmul.

    idx_ref : (Et, 2)        int32 node ids, columns = [src, dest] (streamed)
    ea_ref  : (Et, Ce)       bf16 edge features (streamed)
    xw_ref  : (2N_pad, Co)   bf16; rows [0,N) = x@W_src + bias, [N,2N) = x@W_dest
    we_ref  : (Ce, Co)       bf16 edge-feature weights (resident)
    out_ref : (Et, Co)       Co = n_out padded to 128 lanes (lane-dense store)
    """
    et = idx_ref.shape[0]
    two_n = xw_ref.shape[0]

    idx = idx_ref[...]
    src = idx[:, 0:1]                     # (Et, 1)
    dst = idx[:, 1:2] + n_nodes           # offset into the dest half

    iota = lax.broadcasted_iota(jnp.int32, (et, two_n), 1)
    # Exactly two ones per row (src half + dest half); 0/1 are exact in bf16.
    onehot = jnp.logical_or(iota == src, iota == dst).astype(jnp.bfloat16)

    acc = jnp.dot(onehot, xw_ref[...], preferred_element_type=jnp.float32)
    acc = acc + jnp.dot(ea_ref[...], we_ref[...],
                        preferred_element_type=jnp.float32)
    out_ref[...] = acc.astype(out_ref.dtype)


def _stream_kernel(xwg_ref, ea_ref, we_ref, out_ref):
    """Large-N path: per-edge gathered xw (bias folded) streamed from HBM."""
    acc = xwg_ref[...].astype(jnp.float32)
    acc = acc + jnp.dot(ea_ref[...], we_ref[...],
                        preferred_element_type=jnp.float32)
    out_ref[...] = acc.astype(out_ref.dtype)


@functools.partial(jax.jit, static_argnames=("edge_tile", "onehot_max_nodes"))
def edge_only_conv(x, edge_index, edge_attr, weight, bias, *,
                   edge_tile=1024, onehot_max_nodes=1024):
    """x: [N, Cn], edge_index: [2, E] int, edge_attr: [E, Ce],
    weight: [n_out, 2*Cn + Ce] (torch Linear layout), bias: [n_out]."""
    n_nodes, n_in_node = x.shape
    e, n_in_edge = edge_attr.shape
    n_out = weight.shape[0]
    n_out_pad = _round_up(n_out, 128)          # lane-dense output / xw lanes

    # ---- weight plumbing + per-node hoist (O(N), done once) ----------------
    x32 = x.astype(jnp.float32)
    w_t = weight.T.astype(jnp.float32)                         # [2Cn+Ce, n_out]
    w_t = jnp.pad(w_t, ((0, 0), (0, n_out_pad - n_out)))       # lane-pad n_out
    w_src = w_t[:n_in_node]
    w_dst = w_t[n_in_node:2 * n_in_node]
    w_edge = w_t[2 * n_in_node:].astype(jnp.bfloat16)          # [Ce, Co]
    b = jnp.pad(bias.astype(jnp.float32),
                (0, n_out_pad - n_out)).reshape(1, n_out_pad)

    # Bias folded into the src half: every edge has exactly one src row.
    xw_src = jnp.dot(x32, w_src, preferred_element_type=jnp.float32) + b
    xw_dst = jnp.dot(x32, w_dst, preferred_element_type=jnp.float32)

    # ---- edge tiling: balanced tiles, ragged E via (small) padding ---------
    n_tiles = max(1, _cdiv(e, max(edge_tile, 16)))
    if e > 64 and n_tiles < 2:
        n_tiles = 2                           # keep both v7x TensorCores busy
    e_tile = _round_up(_cdiv(e, n_tiles), 16)
    e_pad = e_tile * n_tiles
    pad = e_pad - e

    ea = jnp.pad(edge_attr.astype(jnp.bfloat16), ((0, pad), (0, 0)))

    grid = (n_tiles,)
    cparams = pltpu.CompilerParams(
        dimension_semantics=("parallel",),
        vmem_limit_bytes=_vmem_limit_bytes())
    out_shape = jax.ShapeDtypeStruct((e_pad, n_out_pad), x.dtype)
    resident = lambda shape: pl.BlockSpec(shape, lambda i: (0, 0))

    if n_nodes <= onehot_max_nodes:
        # Small/medium graphs: fused on-chip one-hot gather (one MXU matmul
        # covering x[src]@W_src + x[dest]@W_dest + bias).
        two_n = 2 * n_nodes
        two_n_pad = _round_up(two_n, 16)
        xw = jnp.concatenate([xw_src, xw_dst], axis=0)
        xw = jnp.pad(xw, ((0, two_n_pad - two_n), (0, 0))).astype(jnp.bfloat16)
        idx = jnp.pad(edge_index.astype(jnp.int32), ((0, 0), (0, pad))).T

        out = pl.pallas_call(
            functools.partial(_onehot_kernel, n_nodes=n_nodes),
            out_shape=out_shape,
            grid_spec=pltpu.PrefetchScalarGridSpec(
                num_scalar_prefetch=0,
                grid=grid,
                in_specs=[
                    pl.BlockSpec((e_tile, 2), lambda i: (i, 0)),          # ids
                    pl.BlockSpec((e_tile, n_in_edge), lambda i: (i, 0)),  # ea
                    resident((two_n_pad, n_out_pad)),                     # xw
                    resident((n_in_edge, n_out_pad)),                     # W_edge
                ],
                out_specs=pl.BlockSpec((e_tile, n_out_pad), lambda i: (i, 0)),
            ),
            compiler_params=cparams,
        )(idx, ea, xw, w_edge)
    else:
        # Large graphs: O(E*N) one-hot would dominate -> XLA row gather in the
        # wrapper, kernel streams the gathered values and adds ea @ W_edge.
        src = edge_index[0].astype(jnp.int32)
        dst = edge_index[1].astype(jnp.int32)
        xwg = xw_src[src] + xw_dst[dst]                  # (E, Co) f32, bias in
        xwg = jnp.pad(xwg, ((0, pad), (0, 0)))

        out = pl.pallas_call(
            _stream_kernel,
            out_shape=out_shape,
            grid_spec=pltpu.PrefetchScalarGridSpec(
                num_scalar_prefetch=0,
                grid=grid,
                in_specs=[
                    pl.BlockSpec((e_tile, n_out_pad), lambda i: (i, 0)),  # xwg
                    pl.BlockSpec((e_tile, n_in_edge), lambda i: (i, 0)),  # ea
                    resident((n_in_edge, n_out_pad)),                     # W_edge
                ],
                out_specs=pl.BlockSpec((e_tile, n_out_pad), lambda i: (i, 0)),
            ),
            compiler_params=cparams,
        )(xwg, ea, w_edge)

    return out[:e, :n_out]


def _reference(x, edge_index, edge_attr, weight, bias):
    src, dest = edge_index[0], edge_index[1]
    cat = jnp.concatenate([x[src], x[dest], edge_attr], axis=1)
    return cat @ weight.T + bias


if __name__ == "__main__":
    n_nodes, n_in_node, n_in_edge, n_out = 16, 8, 8, 32

    key = jax.random.PRNGKey(0)
    kx, kw, kb, ke1, ki1, ke2, ki2, ke3, ki3 = jax.random.split(key, 9)

    x = jax.random.normal(kx, (n_nodes, n_in_node), dtype=jnp.float32)

    # Deterministic torch.nn.Linear-style init: U(-1/sqrt(fan_in), +1/sqrt(fan_in)).
    fan_in = 2 * n_in_node + n_in_edge
    bound = 1.0 / float(fan_in) ** 0.5
    weight = jax.random.uniform(kw, (n_out, fan_in), jnp.float32, -bound, bound)
    bias = jax.random.uniform(kb, (n_out,), jnp.float32, -bound, bound)

    # bf16 MXU operands => loosen tolerance (selection itself stays exact).
    tol = dict(atol=3e-2, rtol=3e-2)

    # Case 1: one-hot gather path, E a multiple of the tile, single-step grid.
    e1 = 64
    ea1 = jax.random.normal(ke1, (e1, n_in_edge), dtype=jnp.float32)
    ei1 = jax.random.randint(ki1, (2, e1), 0, n_nodes, dtype=jnp.int32)
    out1 = jax.block_until_ready(edge_only_conv(x, ei1, ea1, weight, bias))
    ref1 = _reference(x, ei1, ea1, weight, bias)
    assert out1.shape == (e1, n_out)
    assert jnp.allclose(out1, ref1, **tol), float(jnp.max(jnp.abs(out1 - ref1)))

    # Case 2: ragged E + multi-step grid (exercises balanced tiling).
    e2 = 60
    ea2 = jax.random.normal(ke2, (e2, n_in_edge), dtype=jnp.float32)
    ei2 = jax.random.randint(ki2, (2, e2), 0, n_nodes, dtype=jnp.int32)
    out2 = jax.block_until_ready(
        edge_only_conv(x, ei2, ea2, weight, bias, edge_tile=32))
    ref2 = _reference(x, ei2, ea2, weight, bias)
    assert out2.shape == (e2, n_out)
    assert jnp.allclose(out2, ref2, **tol), float(jnp.max(jnp.abs(out2 - ref2)))

    # Case 3: force the large-N (wrapper-gather + stream-add) path.
    e3 = 72
    ea3 = jax.random.normal(ke3, (e3, n_in_edge), dtype=jnp.float32)
    ei3 = jax.random.randint(ki3, (2, e3), 0, n_nodes, dtype=jnp.int32)
    out3 = jax.block_until_ready(
        edge_only_conv(x, ei3, ea3, weight, bias, onehot_max_nodes=0))
    ref3 = _reference(x, ei3, ea3, weight, bias)
    assert out3.shape == (e3, n_out)
    assert jnp.allclose(out3, ref3, **tol), float(jnp.max(jnp.abs(out3 - ref3)))

    print("KERNEL_OK")
</pallas_src>

<mosaic_0001>
module attributes {stable_mosaic.version = 11 : i64} {
  func.func @_onehot_kernel(%arg0: i32, %arg1: memref<64x2xi32, #tpu.memory_space<vmem>>, %arg2: memref<64x8xbf16, #tpu.memory_space<vmem>>, %arg3: memref<32x128xbf16, #tpu.memory_space<vmem>>, %arg4: memref<8x128xbf16, #tpu.memory_space<vmem>>, %arg5: memref<64x128xf32, #tpu.memory_space<vmem>>) attributes {dimension_semantics = [#tpu.dimension_semantics<parallel>], iteration_bounds = array<i64: 1>, scalar_prefetch = 0 : i64, scratch_operands = 0 : i64, tpu.core_type = #tpu.core_type<tc>, window_params = [{transform_indices = @transform_0, window_bounds = array<i64: 64, 2>}, {transform_indices = @transform_1, window_bounds = array<i64: 64, 8>}, {pipeline_mode = #tpu.pipeline_mode<synchronous>, transform_indices = @transform_2, window_bounds = array<i64: 32, 128>}, {pipeline_mode = #tpu.pipeline_mode<synchronous>, transform_indices = @transform_3, window_bounds = array<i64: 8, 128>}, {transform_indices = @transform_4, window_bounds = array<i64: 64, 128>}]} {
    %c0 = arith.constant 0 : index
    %c0_0 = arith.constant 0 : index
    %0 = vector.load %arg1[%c0, %c0_0] : memref<64x2xi32, #tpu.memory_space<vmem>>, vector<64x2xi32>
    %1 = vector.extract_strided_slice %0 {offsets = [0, 0], sizes = [64, 1], strides = [1, 1]} : vector<64x2xi32> to vector<64x1xi32>
    %2 = vector.extract_strided_slice %0 {offsets = [0, 1], sizes = [64, 1], strides = [1, 1]} : vector<64x2xi32> to vector<64x1xi32>
    %c16_i32 = arith.constant 16 : i32
    %3 = vector.broadcast %c16_i32 : i32 to vector<64x1xi32>
    %4 = arith.addi %2, %3 : vector<64x1xi32>
    %5 = tpu.iota {dimensions = array<i32: 1>} : vector<64x32xi32>
    %6 = vector.broadcast %1 : vector<64x1xi32> to vector<64x32xi32>
    %7 = arith.cmpi eq, %5, %6 : vector<64x32xi32>
    %8 = vector.broadcast %4 : vector<64x1xi32> to vector<64x32xi32>
    %9 = arith.cmpi eq, %5, %8 : vector<64x32xi32>
    %10 = arith.ori %7, %9 : vector<64x32xi1>
    %11 = arith.extui %10 : vector<64x32xi1> to vector<64x32xi32>
    %12 = arith.sitofp %11 : vector<64x32xi32> to vector<64x32xf32>
    %13 = arith.truncf %12 : vector<64x32xf32> to vector<64x32xbf16>
    %c0_1 = arith.constant 0 : index
    %c0_2 = arith.constant 0 : index
    %14 = vector.load %arg3[%c0_1, %c0_2] : memref<32x128xbf16, #tpu.memory_space<vmem>>, vector<32x128xbf16>
    %cst = arith.constant dense<0.000000e+00> : vector<64x128xf32>
    %15 = tpu.matmul %13, %14, %cst {dimension_numbers = #tpu.dot_dimension_numbers<[1], [0], [0], [1], [0, 0, 1, 1], [], []>} : vector<64x32xbf16>, vector<32x128xbf16>, vector<64x128xf32> -> vector<64x128xf32>
    %c0_3 = arith.constant 0 : index
    %c0_4 = arith.constant 0 : index
    %16 = vector.load %arg2[%c0_3, %c0_4] : memref<64x8xbf16, #tpu.memory_space<vmem>>, vector<64x8xbf16>
    %c0_5 = arith.constant 0 : index
    %c0_6 = arith.constant 0 : index
    %17 = vector.load %arg4[%c0_5, %c0_6] : memref<8x128xbf16, #tpu.memory_space<vmem>>, vector<8x128xbf16>
    %cst_7 = arith.constant dense<0.000000e+00> : vector<64x128xf32>
    %18 = tpu.matmul %16, %17, %cst_7 {dimension_numbers = #tpu.dot_dimension_numbers<[1], [0], [0], [1], [0, 0, 1, 1], [], []>} : vector<64x8xbf16>, vector<8x128xbf16>, vector<64x128xf32> -> vector<64x128xf32>
    %19 = arith.addf %15, %18 : vector<64x128xf32>
    %c0_8 = arith.constant 0 : index
    %c0_9 = arith.constant 0 : index
    %20 = vector.load %arg5[%c0_8, %c0_9] : memref<64x128xf32, #tpu.memory_space<vmem>>, vector<64x128xf32>
    tpu.vector_store %arg5[%c0_8, %c0_9], %19 {strides = array<i32>} : memref<64x128xf32, #tpu.memory_space<vmem>>, vector<64x128xf32>,
    return
  }
  func.func @transform_0(%arg0: i32) -> (i32, i32) {
    %c0_i32 = arith.constant 0 : i32
    %c0_i32_0 = arith.constant 0 : i32
    return %arg0, %c0_i32 : i32, i32
  }
  func.func @transform_1(%arg0: i32) -> (i32, i32) {
    %c0_i32 = arith.constant 0 : i32
    %c0_i32_0 = arith.constant 0 : i32
    return %arg0, %c0_i32 : i32, i32
  }
  func.func @transform_2(%arg0: i32) -> (i32, i32) {
    %c0_i32 = arith.constant 0 : i32
    %c0_i32_0 = arith.constant 0 : i32
    %c0_i32_1 = arith.constant 0 : i32
    return %c0_i32, %c0_i32_0 : i32, i32
  }
  func.func @transform_3(%arg0: i32) -> (i32, i32) {
    %c0_i32 = arith.constant 0 : i32
    %c0_i32_0 = arith.constant 0 : i32
    %c0_i32_1 = arith.constant 0 : i32
    return %c0_i32, %c0_i32_0 : i32, i32
  }
  func.func @transform_4(%arg0: i32) -> (i32, i32) {
    %c0_i32 = arith.constant 0 : i32
    %c0_i32_0 = arith.constant 0 : i32
    return %arg0, %c0_i32 : i32, i32
  }
}

</mosaic_0001>

<bundles_post_ra>
// kernel: edge_only_conv.1
= control target key start
LH: loop header
LB: loop body
LE: loop exit
PB: predicated region body
PF: predicated region fallthrough
CT: control target
= control target key end

     0   :  { %v428_v0 = vmov 1   ;;  %v429_v7 = vmov 0   ;;  %vm174_vm0 = vcmask 1043456   ;;  %vm161_vm1 = vcmask 64512   ;;  %s533_s0 = inlined_call_operand.vmem [shape: s32[64,2], index: 0, kind: input, shape index: {}]   ;;  %s534_s2 = inlined_call_operand.vmem [shape: bf16[32,128], index: 2, kind: input, shape index: {}]   ;;  %s535_s3 = inlined_call_operand.vmem [shape: bf16[8,128], index: 3, kind: input, shape index: {}]   ;;  %s536_s1 = inlined_call_operand.vmem [shape: bf16[64,8], index: 1, kind: input, shape index: {}]   ;;  %s537_s4 = inlined_call_operand.vmem [shape: f32[64,128], index: 4, kind: output, shape index: {}]  }
   0x1   :  { %414 = vset.pattern.permute.xlu0 %v428_v0  ;;  %412 = vset.pattern.permute.xlu1 %v428_v0  ;;  %v20_v1 = vld [vmem:[%s533_s0 + $0x10] sm:$0xff]  ;;  %v18_v2 = vld [vmem:[%s533_s0] sm:$0xff]  ;;  %v19_v3 = vld [vmem:[%s533_s0 + $0x8] sm:$0xff]  ;;  %v34_v26 = vlaneseq  ;;  %v430_v34 = vmov 0.0   ;;  %vm255_vm9 = vcmask 261120  }
   0x2   :  { %v28_v4 = vadd.s32 16, %v20_v1  ;;  %v26_v5 = vadd.s32 16, %v18_v2  ;;  %v27_v6 = vadd.s32 16, %v19_v3  ;;  %v21_v8 = vld [vmem:[%s533_s0 + $0x18] sm:$0xff]  ;;  %v422_v9 = vld [vmem:[%s534_s2] sm:$0xff]   ;;  %v423_v11 = vld [vmem:[%s534_s2 + $0x8] sm:$0xff]  }
   0x3   :  { %v29_v10 = vadd.s32 16, %v21_v8  ;;  %388 = vmatprep.subr.bf16.mxu0 %v422_v9  ;;  %v23_v12 = vld [vmem:[%s533_s0 + $0x28] sm:$0xff]  ;;  %v140_v13 = vld [vmem:[%s535_s3] sm:$0xf]  ;;  %v24_v16 = vld [vmem:[%s533_s0 + $0x30] sm:$0xff]  ;;  %v35_v29 = vand.u32 127, %v34_v26 }
   0x4   :  { %75 = vperm.xlu0 %414, %v28_v4   ;;  %69 = vperm.xlu1 %412, %v26_v5   ;;  %v22_v14 = vld [vmem:[%s533_s0 + $0x20] sm:$0xff]  ;;  %v176_v15 = vsel %vm174_vm0, %v140_v13, 0  ;;  %v425_v18 = vld [vmem:[%s536_s1 + $0x8] sm:$0xff]   ;;  %v32_v20 = vadd.s32 16, %v24_v16  ;;  %v31_v21 = vadd.s32 16, %v23_v12  ;;  %v25_v22 = vld [vmem:[%s533_s0 + $0x38] sm:$0xff] }
   0x5   :  { %389 = vmatpush3.bf16.msra.mxu0 %v422_v9  ;;  %408 = vmatprep.subr.msk.bf16.mxu1 %vm174_vm0, %v140_v13  ;;  %v424_v17 = vld [vmem:[%s536_s1] sm:$0xff]   ;;  %v30_v19 = vadd.s32 16, %v22_v14  ;;  %v33_v23 = vadd.s32 16, %v25_v22  ;;  %v426_v24 = vld [vmem:[%s536_s1 + $0x10] sm:$0xff]   ;;  %v427_v25 = vld [vmem:[%s536_s1 + $0x18] sm:$0xff]  }
   0x6   :  { %390 = vmatprep.subr.bf16.mxu0 %v423_v11  ;;  %379 = vmatpush3.bf16.msra.mxu1 %v176_v15 }
   0x7   :  { %380 = vmatprep.mubr.msk.bf16.mxu1 %vm161_vm1, %v424_v17 }
   0x8   :  { %415 = vset.pattern.permute.xlu0 %v429_v7  ;;  %72 = vperm.xlu1 %412, %v27_v6  }
   0x9   :  { %37 = vperm.xlu0 %415, %v18_v2   ;;  %391 = vmatpush3.bf16.msra.mxu0 %v423_v11 }
   0xa   :  { %381 = vmatmul.mubr.msk.bf16.vlgmr.msra.gmra.mrb[0].mxu1 %vm161_vm1, %v425_v18 }
   0xb   :  { %384 = vmatprep.mubr.msk.bf16.mxu1 %vm161_vm1, %v426_v24 }
   0xc   :  { %413 = vset.pattern.permute.xlu1 %v429_v7 }
   0xd   :  { %40 = vperm.xlu0 %415, %v19_v3   ;;  %46 = vperm.xlu1 %413, %v21_v8  }
  0x11   :  { %43 = vperm.xlu0 %415, %v20_v1   ;;  %416 = vset.pattern.permute.xlu1 %v428_v0 }
  0x12   :  { %78 = vperm.xlu1 %416, %v29_v10   ;;  %385 = vmatmul.mubr.msk.bf16.gmra.mrb[4].mxu1 %vm161_vm1, %v427_v25 }
  0x15   :  { %52 = vperm.xlu0 %415, %v23_v12  }
  0x16   :  { %417 = vset.pattern.permute.xlu1 %v429_v7 }
  0x17   :  { %49 = vperm.xlu1 %417, %v22_v14  }
  0x19   :  { %55 = vperm.xlu0 %415, %v24_v16  }
  0x1b   :  { %418 = vset.pattern.permute.xlu1 %v428_v0 }
  0x1c   :  { %81 = vperm.xlu1 %418, %v30_v19  }
  0x1d   :  { %420 = vset.pattern.permute.xlu0 %v428_v0 }
  0x1e   :  { %87 = vperm.xlu0 %420, %v32_v20  }
  0x20   :  { %84 = vperm.xlu1 %418, %v31_v21  }
  0x24   :  { %419 = vset.pattern.permute.xlu1 %v429_v7 }
  0x25   :  { %58 = vperm.xlu1 %419, %v25_v22  }
  0x29   :  { %421 = vset.pattern.permute.xlu1 %v428_v0 }
  0x2a   :  { %90 = vperm.xlu1 %421, %v33_v23  }
  0x83   :  { %v70_v27 = vpop.permute.xlu1 %69  ;;  %v76_v28 = vpop.permute.xlu0 %75 }
  0x84   :  { %vm92_vm3 = vcmp.eq.s32.totalorder %v35_v29, %v70_v27  ;;  %vm94_vm8 = vcmp.eq.s32.totalorder %v35_v29, %v76_v28 }
  0x87   :  { %v73_v30 = vpop.permute.xlu1 %72 }
  0x88   :  { %v38_v31 = vpop.permute.xlu0 %37  ;;  %vm93_vm5 = vcmp.eq.s32.totalorder %v35_v29, %v73_v30 }
  0x89   :  { %vm60_vm2 = vcmp.eq.s32.totalorder %v35_v29, %v38_v31 }
  0x8a   :  { %vm100_vm4 = vmor %vm60_vm2, %vm92_vm3 }
  0x8b   :  { %v345_v35 = vsel %vm100_vm4, 1.0, %v430_v34 }
  0x8c   :  { %v41_v32 = vpop.permute.xlu0 %40  ;;  %v47_v33 = vpop.permute.xlu1 %46 }
  0x8d   :  { %vm61_vm6 = vcmp.eq.s32.totalorder %v35_v29, %v41_v32  ;;  %vm63_vm11 = vcmp.eq.s32.totalorder %v35_v29, %v47_v33 }
  0x8e   :  { %vm101_vm7 = vmor %vm61_vm6, %vm93_vm5 }
  0x8f   :  { %v346_v36 = vsel %vm101_vm7, 1.0, %v430_v34 }
  0x90   :  { %v44_v37 = vpop.permute.xlu0 %43  ;;  %v124_v38 = vpack.c.bf16 %v346_v36, %v345_v35 }
  0x91   :  { %vm62_vm10 = vcmp.eq.s32.totalorder %v35_v29, %v44_v37  ;;  %v79_v39 = vpop.permute.xlu1 %78 }
  0x92   :  { %vm102_vm12 = vmor %vm62_vm10, %vm94_vm8  ;;  %vm95_vm13 = vcmp.eq.s32.totalorder %v35_v29, %v79_v39  ;;  %392 = vmatprep.mubr.msk.bf16.mxu0 %vm255_vm9, %v124_v38 }
  0x93   :  { %v347_v40 = vsel %vm102_vm12, 1.0, %v430_v34  ;;  %vm103_vm14 = vmor %vm63_vm11, %vm95_vm13 }
  0x94   :  { %v348_v41 = vsel %vm103_vm14, 1.0, %v430_v34  ;;  %v53_v44 = vpop.permute.xlu0 %52 }
  0x95   :  { %v125_v42 = vpack.c.bf16 %v348_v41, %v347_v40  ;;  %vm65_vm2 = vcmp.eq.s32.totalorder %v35_v29, %v53_v44 }
  0x96   :  { %v50_v43 = vpop.permute.xlu1 %49 }
  0x97   :  { %393 = vmatmul.mubr.msk.bf16.vlgmr.msra.gmra.mrb[0].mxu0 %vm255_vm9, %v125_v42  ;;  %vm64_vm0 = vcmp.eq.s32.totalorder %v35_v29, %v50_v43 }
  0x98   :  { %v56_v46 = vpop.permute.xlu0 %55 }
  0x99   :  { %vm66_vm6 = vcmp.eq.s32.totalorder %v35_v29, %v56_v46 }
  0x9b   :  { %v82_v45 = vpop.permute.xlu1 %81 }
  0x9c   :  { %vm96_vm15 = vcmp.eq.s32.totalorder %v35_v29, %v82_v45 }
  0x9d   :  { %vm104_vm1 = vmor %vm64_vm0, %vm96_vm15  ;;  %v88_v50 = vpop.permute.xlu0 %87 }
  0x9e   :  { %v349_v48 = vsel %vm104_vm1, 1.0, %v430_v34  ;;  %vm98_vm5 = vcmp.eq.s32.totalorder %v35_v29, %v88_v50 }
  0x9f   :  { %v85_v47 = vpop.permute.xlu1 %84  ;;  %vm106_vm7 = vmor %vm66_vm6, %vm98_vm5 }
  0xa0   :  { %vm97_vm3 = vcmp.eq.s32.totalorder %v35_v29, %v85_v47  ;;  %v351_v54 = vsel %vm106_vm7, 1.0, %v430_v34 }
  0xa1   :  { %vm105_vm4 = vmor %vm65_vm2, %vm97_vm3 }
  0xa2   :  { %v350_v49 = vsel %vm105_vm4, 1.0, %v430_v34 }
  0xa3   :  { %v126_v51 = vpack.c.bf16 %v350_v49, %v349_v48 }
  0xa4   :  { %v59_v52 = vpop.permute.xlu1 %58 }
  0xa5   :  { %396 = vmatprep.mubr.msk.bf16.mxu0 %vm255_vm9, %v126_v51  ;;  %vm67_vm8 = vcmp.eq.s32.totalorder %v35_v29, %v59_v52 }
  0xa9   :  { %v91_v53 = vpop.permute.xlu1 %90 }
  0xaa   :  { %vm99_vm10 = vcmp.eq.s32.totalorder %v35_v29, %v91_v53 }
  0xab   :  { %vm107_vm11 = vmor %vm67_vm8, %vm99_vm10 }
  0xac   :  { %v352_v55 = vsel %vm107_vm11, 1.0, %v430_v34 }
  0xad   :  { %v127_v56 = vpack.c.bf16 %v352_v55, %v351_v54 }
  0xaf   :  { %397 = vmatmul.mubr.msk.bf16.gmra.mrb[4].mxu0 %vm255_vm9, %v127_v56 }
  0xdd   :  { %v382_v57 = vpop.f32.mrb[0].mxu1 }
  0xde   :  { %v212_v58 = vpop.f32.mrb[1].mxu1 }
  0xdf   :  { %v383_v59 = vpop.f32.mrb[2].mxu1 }
  0xe0   :  { %v215_v60 = vpop.f32.mrb[3].mxu1 }
  0xe5   :  { %v386_v61 = vpop.f32.mrb[4].mxu1 }
  0xe6   :  { %v228_v62 = vpop.f32.mrb[5].mxu1 }
  0xe7   :  { %v387_v63 = vpop.f32.mrb[6].mxu1 }
  0xe8   :  { %v231_v0 = vpop.f32.mrb[7].mxu1 }
 0x16a   :  { %v394_v1 = vpop.f32.mrb[0].mxu0 }
 0x16b   :  { %v311_v2 = vadd.f32 %v394_v1, %v382_v57  ;;  %v302_v3 = vpop.f32.mrb[1].mxu0 }
 0x16c   :  { %v303_v4 = vadd.f32 %v302_v3, %v212_v58  ;;  %v395_v5 = vpop.f32.mrb[2].mxu0 }
 0x16d   :  { %335 = vst [vmem:[%s537_s4 + $0x10] sm:$0xff] %v311_v2  ;;  %v314_v6 = vadd.f32 %v395_v5, %v383_v59  ;;  %v305_v7 = vpop.f32.mrb[3].mxu0 }
 0x16e   :  { %333 = vst [vmem:[%s537_s4] sm:$0xff] %v303_v4  ;;  %v306_v8 = vadd.f32 %v305_v7, %v215_v60 }
 0x16f   :  { %336 = vst [vmem:[%s537_s4 + $0x18] sm:$0xff] %v314_v6 }
 0x170   :  { %334 = vst [vmem:[%s537_s4 + $0x8] sm:$0xff] %v306_v8 }
 0x182   :  { %v398_v9 = vpop.f32.mrb[4].mxu0 }
 0x183   :  { %v327_v10 = vadd.f32 %v398_v9, %v386_v61  ;;  %v318_v11 = vpop.f32.mrb[5].mxu0 }
 0x184   :  { %v319_v12 = vadd.f32 %v318_v11, %v228_v62  ;;  %v399_v13 = vpop.f32.mrb[6].mxu0 }
 0x185   :  { %339 = vst [vmem:[%s537_s4 + $0x30] sm:$0xff] %v327_v10  ;;  %v330_v14 = vadd.f32 %v399_v13, %v387_v63  ;;  %v321_v15 = vpop.f32.mrb[7].mxu0 }
 0x186   :  { %337 = vst [vmem:[%s537_s4 + $0x20] sm:$0xff] %v319_v12  ;;  %v322_v16 = vadd.f32 %v321_v15, %v231_v0 }
 0x187   :  { %340 = vst [vmem:[%s537_s4 + $0x38] sm:$0xff] %v330_v14 }
 0x188   :  { %338 = vst [vmem:[%s537_s4 + $0x28] sm:$0xff] %v322_v16 }

</bundles_post_ra>
